<compile_context>
chip_gen: v7x
topology: tpu7x:2x2x1
jax: 0.10.0
libtpu: 0.0.40
codegen_flags: <defaults>
</compile_context>

<pallas_src>
import jax
import jax.numpy as jnp
from jax.experimental import pallas as pl
from jax.experimental.pallas import tpu as pltpu


# --------------------------------------------------------------------------------------
# Helpers
# --------------------------------------------------------------------------------------
def _round_up(v, m):
    return ((v + m - 1) // m) * m


def _vmem_capacity_bytes():
    try:
        return int(pltpu.get_tpu_info().vmem_capacity_bytes)
    except Exception:
        return 64 << 20  # conservative: v7x per-TensorCore VMEM


def _channel_tile_candidates(C, itemsize):
    """Descending channel-tile candidates; dtype-aware minimum sublane tile."""
    min_sub = {4: 8, 2: 16, 1: 32}.get(itemsize, 8)
    cands = [c for c in (512, 256, 128, 64, 32, 16, 8)
             if min_sub <= c <= C and C % c == 0]
    if C not in cands:
        cands.append(C)  # full-extent block is always legal
    return sorted(set(cands), reverse=True)


def _pick_lane_tile(hwp, cap=4096):
    """Largest multiple of 128 that divides hwp, capped (hwp is a multiple of 128)."""
    d = min(cap, hwp)
    d -= d % 128
    while d >= 128:
        if hwp % d == 0:
            return d
        d -= 128
    return 128


# --------------------------------------------------------------------------------------
# Fused single-pass kernel: stats + normalize + ReLU on a resident (N, tc, HWp) slab
# --------------------------------------------------------------------------------------
def _make_fused_kernel(hw_valid, m_count, eps):
    inv_m = 1.0 / float(m_count)

    def kernel(x_ref, gamma_ref, beta_ref, o_ref):
        n_batch, tc, hwp = x_ref.shape

        # per-channel mean over the resident slab
        def sum_body(n, tot):
            return tot + jnp.sum(x_ref[n].astype(jnp.float32), axis=1, keepdims=True)

        total = jax.lax.fori_loop(0, n_batch, sum_body,
                                  jnp.zeros((tc, 1), jnp.float32))
        mean = total * inv_m

        # centered (numerically robust) biased variance; mask zero-padded lanes
        lane_ok = None
        if hw_valid != hwp:
            lane_ok = jax.lax.broadcasted_iota(jnp.int32, (tc, hwp), 1) < hw_valid

        def var_body(n, acc):
            d = x_ref[n].astype(jnp.float32) - mean
            if lane_ok is not None:
                d = jnp.where(lane_ok, d, 0.0)
            return acc + jnp.sum(d * d, axis=1, keepdims=True)

        ssq = jax.lax.fori_loop(0, n_batch, var_body,
                                jnp.zeros((tc, 1), jnp.float32))
        inv_std = jax.lax.rsqrt(ssq * inv_m + eps)
        scale = gamma_ref[...] * inv_std           # (tc, 1)
        shift = beta_ref[...] - mean * scale       # (tc, 1)

        # apply y = max(x * scale + shift, 0) from the resident copy
        @pl.loop(0, n_batch)
        def _(n):
            xf = x_ref[n].astype(jnp.float32)
            o_ref[n] = jnp.maximum(xf * scale + shift, 0.0).astype(o_ref.dtype)

    return kernel


# --------------------------------------------------------------------------------------
# Two-pass fallback kernels
# --------------------------------------------------------------------------------------
def _stats_kernel(x_ref, psum_ref, psumsq_ref, acc_s_ref, acc_q_ref):
    # grid = (S, n_c, N, n_hw_s); reduction axes are 2 and 3 (innermost).
    n = pl.program_id(2)
    hw = pl.program_id(3)

    @pl.when(jnp.logical_and(n == 0, hw == 0))
    def _():
        acc_s_ref[...] = jnp.zeros_like(acc_s_ref)
        acc_q_ref[...] = jnp.zeros_like(acc_q_ref)

    x = x_ref[0].astype(jnp.float32)            # (tc, thw)
    thw = x.shape[-1]
    s_acc = acc_s_ref[...]
    q_acc = acc_q_ref[...]
    for g in range(thw // 128):                 # lane-dense VPU accumulation: no XLU
        blk = x[:, g * 128:(g + 1) * 128]       # reduce / masked (tc,1) store per step
        s_acc = s_acc + blk
        q_acc = q_acc + blk * blk
    acc_s_ref[...] = s_acc
    acc_q_ref[...] = q_acc

    @pl.when(jnp.logical_and(n == pl.num_programs(2) - 1,
                             hw == pl.num_programs(3) - 1))
    def _():
        psum_ref[0] = jnp.sum(acc_s_ref[...], axis=1, keepdims=True)
        psumsq_ref[0] = jnp.sum(acc_q_ref[...], axis=1, keepdims=True)


def _apply_kernel(x_ref, scale_ref, shift_ref, o_ref):
    x = x_ref[0].astype(jnp.float32)            # (tc, thw)
    y = x * scale_ref[...] + shift_ref[...]
    o_ref[0] = jnp.maximum(y, 0.0).astype(o_ref.dtype)


# --------------------------------------------------------------------------------------
# Wrapper
# --------------------------------------------------------------------------------------
def batchnorm_relu(x, gamma, beta, eps=1e-5, force_two_pass=False):
    """Training-mode BatchNorm2d (batch statistics) + ReLU. x: (N, C, H, W)."""
    N, C, H, W = x.shape
    HW = H * W
    M = N * HW
    itemsize = jnp.dtype(x.dtype).itemsize

    # Lane-dense last dim: pad H*W up to a multiple of 128 (pads are zero; stats use the
    # true count M; pad output columns are cropped). Free when HW is already aligned.
    HWp = max(128, _round_up(HW, 128))
    x3 = x.reshape(N, C, HW)
    if HWp != HW:
        x3 = jnp.pad(x3, ((0, 0), (0, 0), (0, HWp - HW)))

    gamma_c1 = gamma.astype(jnp.float32).reshape(C, 1)
    beta_c1 = beta.astype(jnp.float32).reshape(C, 1)

    vmem_cap = _vmem_capacity_bytes()
    budget = min(vmem_cap - (16 << 20), 96 << 20)
    cands = _channel_tile_candidates(C, itemsize)

    # ------------------ fused single-pass path (1 read + 1 write of x) ------------------
    fused_tc = None
    fused_est = 0
    if not force_two_pass:
        def _est(tc):
            slab = N * tc * HWp * itemsize
            # double-buffered input slab + double-buffered output slab + f32 temp headroom
            return 4 * slab + 2 * (N * tc * HWp * 4)

        fits = [t for t in cands if _est(t) <= budget]
        for min_tiles in (4, 2, 1):   # prefer >=4 channel tiles: both v7x cores busy and
            opts = [t for t in fits if C // t >= min_tiles]   # slab DMAs stay pipelined
            if opts:
                fused_tc = opts[0]
                fused_est = _est(fused_tc)
                break

    if fused_tc is not None:
        tc = fused_tc
        n_c = C // tc
        fused_limit = int(max(32 << 20, min(budget, fused_est + (8 << 20))))
        out3 = pl.pallas_call(
            _make_fused_kernel(HW, M, eps),
            out_shape=jax.ShapeDtypeStruct((N, C, HWp), x.dtype),
            grid=(n_c,),
            in_specs=[
                pl.BlockSpec((N, tc, HWp), lambda c: (0, c, 0)),
                pl.BlockSpec((tc, 1), lambda c: (c, 0)),
                pl.BlockSpec((tc, 1), lambda c: (c, 0)),
            ],
            out_specs=pl.BlockSpec((N, tc, HWp), lambda c: (0, c, 0)),
            compiler_params=pltpu.CompilerParams(
                dimension_semantics=("parallel",),
                vmem_limit_bytes=fused_limit,
            ),
            cost_estimate=pl.CostEstimate(
                flops=7 * N * C * HWp,
                transcendentals=C,
                bytes_accessed=2 * N * C * HWp * itemsize + 2 * C * 4,
            ),
        )(x3, gamma_c1, beta_c1)
    else:
        # ------------------------- two-pass fallback -------------------------
        tc = max([t for t in cands if t <= 64], default=cands[-1])
        n_c = C // tc
        thw = _pick_lane_tile(HWp, cap=4096)
        n_hw = HWp // thw

        # Ensure a parallel axis of extent >= 2 for the stats pass when n_c == 1
        # (partial sums over S, finished in the wrapper) -> both v7x cores contribute.
        S = 2 if (n_c == 1 and n_hw % 2 == 0 and n_hw >= 2) else 1
        n_hw_s = n_hw // S

        psum, psumsq = pl.pallas_call(
            _stats_kernel,
            out_shape=(jax.ShapeDtypeStruct((S, C, 1), jnp.float32),
                       jax.ShapeDtypeStruct((S, C, 1), jnp.float32)),
            grid=(S, n_c, N, n_hw_s),
            in_specs=[pl.BlockSpec(
                (1, tc, thw), lambda s, c, n, hw: (n, c, s * n_hw_s + hw))],
            out_specs=(
                pl.BlockSpec((1, tc, 1), lambda s, c, n, hw: (s, c, 0)),
                pl.BlockSpec((1, tc, 1), lambda s, c, n, hw: (s, c, 0)),
            ),
            scratch_shapes=[pltpu.VMEM((tc, 128), jnp.float32),
                            pltpu.VMEM((tc, 128), jnp.float32)],
            compiler_params=pltpu.CompilerParams(
                dimension_semantics=("parallel", "parallel", "arbitrary", "arbitrary"),
                vmem_limit_bytes=32 << 20,
            ),
            cost_estimate=pl.CostEstimate(
                flops=3 * N * C * HWp,
                transcendentals=0,
                bytes_accessed=N * C * HWp * itemsize + 2 * S * C * 4,
            ),
        )(x3)

        # Fold stats + affine into per-channel scale / shift (tiny (C,) math).
        x_sum = jnp.sum(psum, axis=0)[:, 0]
        x_sumsq = jnp.sum(psumsq, axis=0)[:, 0]
        mean = x_sum / M
        # NOTE: E[x^2] - mean^2 (clamped) only on this fallback path; the fused path
        # uses the centered form since x is resident in VMEM.
        var = jnp.maximum(x_sumsq / M - mean * mean, 0.0)
        inv_std = jax.lax.rsqrt(var + eps)
        scale = gamma.astype(jnp.float32) * inv_std
        shift = beta.astype(jnp.float32) - mean * scale

        out3 = pl.pallas_call(
            _apply_kernel,
            out_shape=jax.ShapeDtypeStruct((N, C, HWp), x.dtype),
            grid=(n_c, N, n_hw),
            in_specs=[
                pl.BlockSpec((1, tc, thw), lambda c, n, hw: (n, c, hw)),
                pl.BlockSpec((tc, 1), lambda c, n, hw: (c, 0)),
                pl.BlockSpec((tc, 1), lambda c, n, hw: (c, 0)),
            ],
            out_specs=pl.BlockSpec((1, tc, thw), lambda c, n, hw: (n, c, hw)),
            compiler_params=pltpu.CompilerParams(
                dimension_semantics=("parallel", "parallel", "parallel"),
                vmem_limit_bytes=32 << 20,
            ),
            cost_estimate=pl.CostEstimate(
                flops=3 * N * C * HWp,
                transcendentals=0,
                bytes_accessed=2 * N * C * HWp * itemsize + 2 * C * 4,
            ),
        )(x3, scale.reshape(C, 1), shift.reshape(C, 1))

    if HWp != HW:
        out3 = out3[:, :, :HW]
    return out3.reshape(N, C, H, W)


# --------------------------------------------------------------------------------------
# Reference + self-test
# --------------------------------------------------------------------------------------
def _reference(x, gamma, beta, eps=1e-5):
    mean = jnp.mean(x, axis=(0, 2, 3), keepdims=True)
    var = jnp.mean((x - mean) ** 2, axis=(0, 2, 3), keepdims=True)
    y = (x - mean) * jax.lax.rsqrt(var + eps)
    y = y * gamma.reshape(1, -1, 1, 1) + beta.reshape(1, -1, 1, 1)
    return jnp.maximum(y, 0.0)


if __name__ == "__main__":
    root = jax.random.PRNGKey(0)

    cases = [
        ((2, 4, 16, 16), False),   # fused single-pass path (HW % 128 == 0)
        ((2, 4, 16, 16), True),    # two-pass fallback path
        ((2, 8, 7, 7), False),     # fused with zero-padded / masked lanes (HW = 49)
        ((2, 8, 7, 7), True),      # two-pass with zero-padded lanes
    ]
    for idx, (shape, force_two) in enumerate(cases):
        kx, kg, kb = jax.random.split(jax.random.fold_in(root, idx), 3)
        N, C, H, W = shape
        x = jax.random.normal(kx, shape, dtype=jnp.float32)
        # PyTorch default init is gamma=1, beta=0; randomize to exercise the affine path.
        gamma = 1.0 + 0.1 * jax.random.normal(kg, (C,), dtype=jnp.float32)
        beta = 0.1 * jax.random.normal(kb, (C,), dtype=jnp.float32)

        out = jax.block_until_ready(
            batchnorm_relu(x, gamma, beta, force_two_pass=force_two))
        ref = _reference(x, gamma, beta)
        assert out.shape == shape
        err = float(jnp.max(jnp.abs(out - ref)))
        assert err < 3e-5, (shape, force_two, err)

    print("KERNEL_OK")
</pallas_src>

<mosaic_0001>
module attributes {stable_mosaic.version = 11 : i64} {
  func.func @kernel(%arg0: i32, %arg1: memref<2x4x256xf32, #tpu.memory_space<vmem>>, %arg2: memref<4x1xf32, #tpu.memory_space<vmem>>, %arg3: memref<4x1xf32, #tpu.memory_space<vmem>>, %arg4: memref<2x4x256xf32, #tpu.memory_space<vmem>>) attributes {dimension_semantics = [#tpu.dimension_semantics<parallel>], iteration_bounds = array<i64: 1>, scalar_prefetch = 0 : i64, scratch_operands = 0 : i64, tpu.core_type = #tpu.core_type<tc>, window_params = [{transform_indices = @transform_0, window_bounds = array<i64: 2, 4, 256>}, {transform_indices = @transform_1, window_bounds = array<i64: 4, 1>}, {transform_indices = @transform_2, window_bounds = array<i64: 4, 1>}, {transform_indices = @transform_3, window_bounds = array<i64: 2, 4, 256>}]} {
    %cst = arith.constant 0.000000e+00 : f32
    %0 = vector.broadcast %cst : f32 to vector<4x1xf32>
    %c0_i32 = arith.constant 0 : i32
    %c2_i32 = arith.constant 2 : i32
    %1 = arith.addi %c0_i32, %c2_i32 : i32
    %c1_i32 = arith.constant 1 : i32
    %2 = scf.for %arg5 = %c0_i32 to %1 step %c1_i32 iter_args(%arg6 = %0) -> (vector<4x1xf32>)  : i32 {
      %19 = arith.index_cast %arg5 : i32 to index
      %c0_16 = arith.constant 0 : index
      %c0_17 = arith.constant 0 : index
      %20 = vector.load %arg1[%19, %c0_16, %c0_17] : memref<2x4x256xf32, #tpu.memory_space<vmem>>, vector<1x4x256xf32>
      %21 = vector.shape_cast %20 : vector<1x4x256xf32> to vector<4x256xf32>
      %cst_18 = arith.constant dense<0.000000e+00> : vector<4xf32>
      %22 = vector.multi_reduction <add>, %21, %cst_18 [1] : vector<4x256xf32> to vector<4xf32>
      %23 = vector.shape_cast %22 : vector<4xf32> to vector<4x1xf32>
      %24 = arith.addf %arg6, %23 : vector<4x1xf32>
      scf.yield %24 : vector<4x1xf32>
    }
    %c2_i32_0 = arith.constant 2 : i32
    %cst_1 = arith.constant 0.001953125 : f32
    %3 = vector.broadcast %cst_1 : f32 to vector<4x1xf32>
    %4 = arith.mulf %2, %3 : vector<4x1xf32>
    %cst_2 = arith.constant 0.000000e+00 : f32
    %5 = vector.broadcast %cst_2 : f32 to vector<4x1xf32>
    %c0_i32_3 = arith.constant 0 : i32
    %c2_i32_4 = arith.constant 2 : i32
    %6 = arith.addi %c0_i32_3, %c2_i32_4 : i32
    %c1_i32_5 = arith.constant 1 : i32
    %7 = scf.for %arg5 = %c0_i32_3 to %6 step %c1_i32_5 iter_args(%arg6 = %5) -> (vector<4x1xf32>)  : i32 {
      %19 = arith.index_cast %arg5 : i32 to index
      %c0_16 = arith.constant 0 : index
      %c0_17 = arith.constant 0 : index
      %20 = vector.load %arg1[%19, %c0_16, %c0_17] : memref<2x4x256xf32, #tpu.memory_space<vmem>>, vector<1x4x256xf32>
      %21 = vector.shape_cast %20 : vector<1x4x256xf32> to vector<4x256xf32>
      %22 = vector.broadcast %4 : vector<4x1xf32> to vector<4x256xf32>
      %23 = arith.subf %21, %22 : vector<4x256xf32>
      %24 = arith.mulf %23, %23 : vector<4x256xf32>
      %cst_18 = arith.constant dense<0.000000e+00> : vector<4xf32>
      %25 = vector.multi_reduction <add>, %24, %cst_18 [1] : vector<4x256xf32> to vector<4xf32>
      %26 = vector.shape_cast %25 : vector<4xf32> to vector<4x1xf32>
      %27 = arith.addf %arg6, %26 : vector<4x1xf32>
      scf.yield %27 : vector<4x1xf32>
    }
    %c2_i32_6 = arith.constant 2 : i32
    %cst_7 = arith.constant 0.001953125 : f32
    %8 = vector.broadcast %cst_7 : f32 to vector<4x1xf32>
    %9 = arith.mulf %7, %8 : vector<4x1xf32>
    %cst_8 = arith.constant 9.99999974E-6 : f32
    %10 = vector.broadcast %cst_8 : f32 to vector<4x1xf32>
    %11 = arith.addf %9, %10 : vector<4x1xf32>
    %12 = math.rsqrt %11 : vector<4x1xf32>
    %c0 = arith.constant 0 : index
    %c0_9 = arith.constant 0 : index
    %13 = vector.load %arg2[%c0, %c0_9] : memref<4x1xf32, #tpu.memory_space<vmem>>, vector<4x1xf32>
    %14 = arith.mulf %13, %12 : vector<4x1xf32>
    %c0_10 = arith.constant 0 : index
    %c0_11 = arith.constant 0 : index
    %15 = vector.load %arg3[%c0_10, %c0_11] : memref<4x1xf32, #tpu.memory_space<vmem>>, vector<4x1xf32>
    %16 = arith.mulf %4, %14 : vector<4x1xf32>
    %17 = arith.subf %15, %16 : vector<4x1xf32>
    %c0_i32_12 = arith.constant 0 : i32
    %c2_i32_13 = arith.constant 2 : i32
    %18 = arith.addi %c0_i32_12, %c2_i32_13 : i32
    %c1_i32_14 = arith.constant 1 : i32
    scf.for %arg5 = %c0_i32_12 to %18 step %c1_i32_14  : i32 {
      %c1_i32_16 = arith.constant 1 : i32
      %19 = arith.muli %arg5, %c1_i32_16 : i32
      %c0_i32_17 = arith.constant 0 : i32
      %20 = arith.addi %c0_i32_17, %19 : i32
      %21 = arith.index_cast %20 : i32 to index
      %c0_18 = arith.constant 0 : index
      %c0_19 = arith.constant 0 : index
      %22 = vector.load %arg1[%21, %c0_18, %c0_19] : memref<2x4x256xf32, #tpu.memory_space<vmem>>, vector<1x4x256xf32>
      %23 = vector.shape_cast %22 : vector<1x4x256xf32> to vector<4x256xf32>
      %24 = vector.broadcast %14 : vector<4x1xf32> to vector<4x256xf32>
      %25 = arith.mulf %23, %24 : vector<4x256xf32>
      %26 = vector.broadcast %17 : vector<4x1xf32> to vector<4x256xf32>
      %27 = arith.addf %25, %26 : vector<4x256xf32>
      %cst_20 = arith.constant 0.000000e+00 : f32
      %28 = vector.broadcast %cst_20 : f32 to vector<4x256xf32>
      %29 = arith.maximumf %27, %28 : vector<4x256xf32>
      %30 = arith.index_cast %20 : i32 to index
      %c0_21 = arith.constant 0 : index
      %c0_22 = arith.constant 0 : index
      %31 = vector.load %arg4[%30, %c0_21, %c0_22] : memref<2x4x256xf32, #tpu.memory_space<vmem>>, vector<1x4x256xf32>
      %32 = vector.shape_cast %31 : vector<1x4x256xf32> to vector<4x256xf32>
      %33 = vector.shape_cast %29 : vector<4x256xf32> to vector<1x4x256xf32>
      tpu.vector_store %arg4[%30, %c0_21, %c0_22], %33 {strides = array<i32>} : memref<2x4x256xf32, #tpu.memory_space<vmem>>, vector<1x4x256xf32>,
    }
    %c2_i32_15 = arith.constant 2 : i32
    return
  }
  func.func @transform_0(%arg0: i32) -> (i32, i32, i32) {
    %c0_i32 = arith.constant 0 : i32
    %c0_i32_0 = arith.constant 0 : i32
    %c0_i32_1 = arith.constant 0 : i32
    return %c0_i32, %arg0, %c0_i32_0 : i32, i32, i32
  }
  func.func @transform_1(%arg0: i32) -> (i32, i32) {
    %c0_i32 = arith.constant 0 : i32
    %c0_i32_0 = arith.constant 0 : i32
    return %arg0, %c0_i32 : i32, i32
  }
  func.func @transform_2(%arg0: i32) -> (i32, i32) {
    %c0_i32 = arith.constant 0 : i32
    %c0_i32_0 = arith.constant 0 : i32
    return %arg0, %c0_i32 : i32, i32
  }
  func.func @transform_3(%arg0: i32) -> (i32, i32, i32) {
    %c0_i32 = arith.constant 0 : i32
    %c0_i32_0 = arith.constant 0 : i32
    %c0_i32_1 = arith.constant 0 : i32
    return %c0_i32, %arg0, %c0_i32_0 : i32, i32, i32
  }
}

</mosaic_0001>

<bundles_post_ra>
// kernel: tpu_custom_call.1
= control target key start
LH: loop header
LB: loop body
LE: loop exit
PB: predicated region body
PF: predicated region fallthrough
CT: control target
= control target key end

     0   :  { %8 = vsyncpa [#allocation3], 0  ;;  %s392_s0 = inlined_call_operand.hbm [shape: f32[2,4,256], index: 0, kind: input, shape index: {}]   ;;  %s393_s1 = inlined_call_operand.vmem [shape: f32[4,1], index: 1, kind: input, shape index: {}]   ;;  %s394_s2 = inlined_call_operand.vmem [shape: f32[4,1], index: 2, kind: input, shape index: {}]   ;;  %s395_s3 = inlined_call_operand.hbm [shape: f32[2,4,256], index: 3, kind: output, shape index: {}]  }
   0x1   :  { %9 = vsyncpa [#allocation4], 0  ;;  %s326_s12 = smov [#allocation2]   ;;  %s238_s16 = scalar_lea.hbm %s392_s0, 256 }
   0x2   :  { %s15_s13 = sshll.u32 %s326_s12, 4  ;;  %p239_p0 = scmp.ne.s32.totalorder %s392_s0, %s238_s16  ;;  %s16_s13 = int_to_ptr.vmem [resolvable:$true] %s15_s13 }
   0x3   :  { %p242_p1 = scmp.lt.u32.totalorder %s238_s16, %s392_s0 }
   0x5   :  { %p244_p2 = pnand %p242_p1, %p239_p0 }
   0x7   :  { %247 = shalt.err (!%p244_p2)
}
   0x8   :  { %s248_s21 = scalar_lea.vmem %s16_s13, 256  ;;  %p253_p4 = scmp.lt.s32.totalorder %s16_s13, %s16_s13 }
   0x9   :  { %p249_p3 = scmp.ne.s32.totalorder %s16_s13, %s248_s21  ;;  %p254_p5 = scmp.lt.s32.totalorder %s248_s21, %s248_s21 }
   0xb   :  { %p255_p6 = por %p254_p5, %p253_p4 }
   0xd   :  { %p256_p7 = pnand %p255_p6, %p249_p3 }
   0xf   :  { %259 = shalt.err (!%p256_p7)
}
  0x10   :  { %s327_s22 = smov 128   ;;  %s328_s23 = smov 8  }
  0x11   :  { %21 = dma.hbm_to_vmem [thread:$0]  %s392_s0, 256, %s16_s13, [#allocation3], %s327_s22, %s327_s22, %s328_s23  }
  0x12   :  { %302 = dma.done.wait [#allocation3], 256  }
  0x13   :  { %303 = vsyncadd [#allocation3], 4294967040  ;;  %v306_v0 = vmov 0.0   ;;  %s310_s26 = smov 0  }
  0x14 LB: > { %s184_s27 = sshll.u32 %s312_s26, 3  ;;  %vm43_vm0 = vcmask 1043456   ;;  %s34_s26 = sadd.s32 1, %s312_s26   ;;  %s312_s26 = sphi %s310_s26, %s34_s26   ;;  %v308_v0 = vphi %v306_v0, %v307_v0  }
  0x15   : > { %s38_s28 = scalar_lea.vmem [#allocation2], %s184_s27  ;;  %p31_p8 = scmp.ge.s32.totalorder %s34_s26, 2  }
  0x16   : > { %v39_v1 = vld [vmem:[%s38_s28] sm:$0xff]  ;;  %v314_v9 = vmov (%p31_p8), 0.0   ;;  %s318_s0 = smov (%p31_p8), 0  }
  0x17   : > { %v41_v2 = vcombine.high %v39_v1, %v39_v1  ;;  %v44_v3 = vsel %vm43_vm0, %v39_v1, 0.0 }
  0x19   : > { %v45_v4 = vsel %vm43_vm0, %v41_v2, 0.0 }
  0x1a   : > { %v46_v5 = vadd.f32 %v45_v4, %v44_v3 }
  0x1c   : > { %47 = vadd.xlane.f32.xlu0 %v46_v5 }
  0xa6   :  { %33 = sbr.rel (!%p31_p8) target bundleno = 20 (0x14), region = 61 }
  0xa9   : > { %v48_v6 = vpop.xlane.xlu0 %47 }
  0xaa   : > { %v49_v7 = vadd.f32 %v308_v0, %v48_v6  }
  0xac   : > { %v307_v0 = vmov %v49_v7   ;;  %v50_v8 = vmul.f32 (%p31_p8), 0.001953125, %v49_v7 }
  0xad LB: > { %v66_v10 = vlaneseq  ;;  %v329_v11 = vmov 839922192   ;;  %s185_s29 = sshll.u32 %s320_s0, 3  ;;  %s56_s0 = sadd.s32 1, %s320_s0   ;;  %s320_s0 = sphi %s318_s0, %s56_s0   ;;  %v316_v9 = vphi %v314_v9, %v315_v9  }
  0xae   : > { %v64_v12 = vunpack.c.l.s4 %v329_v11  ;;  %s60_s30 = scalar_lea.vmem [#allocation2], %s185_s29  ;;  %p53_p9 = scmp.ge.s32.totalorder %s56_s0, 2  }
  0xaf   : > { %v67_v13 = vshrl.u32 %v66_v10, 7  ;;  %v61_v16 = vld [vmem:[%s60_s30] sm:$0xff]  ;;  %s322_s8 = smov (%p53_p9), 0  }
  0xb0   : > { %v65_v14 = vunpack.c.0.s8 %v64_v12  ;;  %v86_v28 = vld [vmem:[%s393_s1] sm:$0xf] (%p53_p9) }
  0xb1   :  { %v88_v31 = vld [vmem:[%s394_s2] sm:$0xf] (%p53_p9) }
  0xb2   : > { %v68_v15 = vsub.s32 %v65_v14, %v67_v13 }
  0xb4   : > { %v69_v17 = vrot.slane %v50_v8, %v68_v15 }
  0xb6   : > { %v71_v18 = vsub.f32 %v61_v16, %v69_v17 }
  0xb8   : > { %v72_v19 = vmul.f32 %v71_v18, %v71_v18 }
  0xba   : > { %v74_v20 = vcombine.high %v72_v19, %v72_v19  ;;  %v77_v21 = vsel %vm43_vm0, %v72_v19, 0.0 }
  0xbc   : > { %v78_v22 = vsel %vm43_vm0, %v74_v20, 0.0 }
  0xbd   : > { %v79_v23 = vadd.f32 %v78_v22, %v77_v21 }
  0xbf   : > { %80 = vadd.xlane.f32.xlu0 %v79_v23 }
 0x149   :  { %55 = sbr.rel (!%p53_p9) target bundleno = 173 (0xad), region = 72 }
 0x14c   : > { %v81_v24 = vpop.xlane.xlu0 %80 }
 0x14d   : > { %v82_v25 = vadd.f32 %v316_v9, %v81_v24  }
 0x14f   : > { %v315_v9 = vmov %v82_v25   ;;  %v83_v26 = vmul.f32 (%p53_p9), 0.001953125, %v82_v25 }
 0x151   :  { %v84_v27 = vadd.f32 1e-05, %v83_v26 }
 0x153   :  { %235 = vrsqrt.f32 %v84_v27 }
 0x15d   :  { %v236_v29 = vpop.eup %235 }
 0x15e   :  { %v87_v30 = vmul.f32 %v236_v29, %v86_v28 }
 0x160   :  { %v89_v32 = vmul.f32 %v87_v30, %v50_v8 }
 0x162   :  { %v90_v33 = vsub.f32 %v88_v31, %v89_v32 }
 0x163 LB: > { %v330_v34 = vmov 0   ;;  %s186_s9 = sshll.u32 %s324_s8, 3  ;;  %s96_s8 = sadd.s32 1, %s324_s8   ;;  %s324_s8 = sphi %s322_s8, %s96_s8  }
 0x164   : > { %237 = vset.pattern.permute.xlu0 %v330_v34  ;;  %s99_s1 = scalar_lea.vmem [#allocation2], %s186_s9  ;;  %s129_s2 = scalar_lea.vmem [#allocation5], %s186_s9 }
 0x165   : > { %103 = vperm.xlu0 %237, %v87_v30   ;;  %v100_v37 = vld [vmem:[%s99_s1] sm:$0xff]  ;;  %p93_p10 = scmp.ge.s32.totalorder %s96_s8, 2  }
 0x166   :  { %s331_s10 = smov (%p93_p10), [#allocation5]  }
 0x167   :  { %s136_s11 = sshll.u32 (%p93_p10), %s331_s10, 4  ;;  %s137_s11 = int_to_ptr.vmem [resolvable:$true] %s136_s11 }
 0x168   :  { %s260_s12 = scalar_lea.vmem (%p93_p10), %s137_s11, 256  ;;  %p265_p12 = scmp.lt.s32.totalorder (%p93_p10), %s137_s11, %s137_s11 }
 0x169   : > { %116 = vperm.xlu0 %237, %v90_v33   ;;  %p261_p11 = scmp.ne.s32.totalorder (%p93_p10), %s137_s11, %s260_s12  ;;  %p266_p13 = scmp.lt.s32.totalorder (%p93_p10), %s260_s12, %s260_s12 }
 0x16b   :  { %p267_p0 = por (%p93_p10), %p266_p13, %p265_p12 }
 0x16d   :  { %p268_p1 = pnand (%p93_p10), %p267_p0, %p261_p11 }
 0x1e4   : > { %v104_v35 = vpop.permute.xlu0 %103 }
 0x1e5   : > { %v111_v36 = vrot.slane %v104_v35, %v68_v15 }
 0x1e7   : > { %v113_v39 = vmul.f32 %v111_v36, %v100_v37 }
 0x1e8   : > { %v117_v38 = vpop.permute.xlu0 %116 }
 0x1e9   : > { %v124_v40 = vrot.slane %v117_v38, %v68_v15  ;;  %95 = sbr.rel (!%p93_p10) target bundleno = 355 (0x163), region = 83 }
 0x1eb   : > { %v126_v41 = vadd.f32 %v124_v40, %v113_v39 }
 0x1ed   : > { %v127_v42 = vmax.f32 %v126_v41, 0.0 }
 0x1ef   : > { %130 = vst [vmem:[%s129_s2] sm:$0xff] %v127_v42 }
 0x1f0   :  { %271 = shalt.err (!%p268_p1)
}
 0x1f1   :  { %s272_s15 = scalar_lea.hbm %s395_s3, 256 }
 0x1f2   :  { %p273_p2 = scmp.ne.s32.totalorder %s395_s3, %s272_s15  ;;  %p276_p3 = scmp.lt.u32.totalorder %s272_s15, %s395_s3 }
 0x1f4   :  { %p278_p4 = pnand %p276_p3, %p273_p2 }
 0x1f6   :  { %281 = shalt.err (!%p278_p4)
}
 0x1f7   :  { %142 = dma.vmem_to_hbm [thread:$0]  %s137_s11, 256, %s395_s3, [#allocation4], %s327_s22, %s327_s22, %s328_s23  }
 0x1f8   :  { %304 = dma.done.wait [#allocation4], 256  }
 0x1f9   :  { %305 = vsyncadd [#allocation4], 4294967040 }
 0x1fa   :  { %146 = vsyncpa [#allocation3], 1 }
 0x1fb   :  { %147 = vsyncpa [#allocation4], 1 }

</bundles_post_ra>
